<compile_context>
chip_gen: v7x
topology: tpu7x:2x2x1
jax: 0.10.0
libtpu: 0.0.40
codegen_flags: <defaults>
</compile_context>

<pallas_src>
import math
from functools import partial

import jax
import jax.numpy as jnp
from jax.experimental import pallas as pl
from jax.experimental.pallas import tpu as pltpu


def _vmem_limit_bytes():
    """Generation-aware scoped-VMEM limit: ~65% of capacity, capped at 64 MiB."""
    cap = None
    try:
        cap = getattr(pltpu.get_tpu_info(), "vmem_capacity_bytes", None)
    except Exception:
        cap = None
    if not cap:
        cap = 64 * 1024 * 1024  # conservative (v7x physical)
    return max(16 * 1024 * 1024, min(int(cap * 0.65), 64 * 1024 * 1024))


def _pick_tile(dim, target, quantum=8):
    """Largest divisor of `dim` that is <= target and a multiple of `quantum`.

    Falls back to the full dimension (always a legal block) only when no such
    divisor exists — never silently creates an oversized non-divisor tile.
    """
    if dim <= target:
        return dim
    start = (target // quantum) * quantum
    for t in range(start, 0, -quantum):
        if dim % t == 0:
            return t
    return dim


# ---------------------------------------------------------------------------
# Tiled linear: y = x @ W_T + b   (bf16 MXU operands, f32 accumulation)
# ---------------------------------------------------------------------------
def _linear_kernel(x_ref, w_ref, b_ref, o_ref, acc_ref):
    k = pl.program_id(2)

    @pl.when(k == 0)
    def _():
        acc_ref[...] = jnp.zeros_like(acc_ref)

    # Weights arrive pre-cast to bf16 (HBM storage is bf16); activation cast is
    # the single in-kernel cast (no-op when the input is already bf16).
    acc_ref[...] += jnp.dot(
        x_ref[...].astype(jnp.bfloat16),
        w_ref[...].astype(jnp.bfloat16),
        preferred_element_type=jnp.float32,
    )

    @pl.when(k == pl.num_programs(2) - 1)
    def _():
        o_ref[...] = (acc_ref[...] + b_ref[...].astype(jnp.float32)).astype(o_ref.dtype)


def linear(x, w_t, b, *, out_dtype=None, tm=512, tn=512, tk=512):
    """y = x @ w_t + b  with x:(M, K), w_t:(K, N), b:(N,)."""
    M, K = x.shape
    N = w_t.shape[1]
    out_dtype = out_dtype or x.dtype
    tm = _pick_tile(M, tm, 16)    # sublane quantum (bf16-safe)
    tn = _pick_tile(N, tn, 128)   # lane quantum
    tk = _pick_tile(K, tk, 128)   # lane quantum (x block) / sublane (w block)
    grid = (M // tm, N // tn, K // tk)
    cost = pl.CostEstimate(
        flops=2 * M * N * K,
        transcendentals=0,
        bytes_accessed=(x.size * x.dtype.itemsize * (N // tn)
                        + w_t.size * w_t.dtype.itemsize * (M // tm)
                        + M * N * jnp.dtype(out_dtype).itemsize
                        + N * b.dtype.itemsize),
    )
    return pl.pallas_call(
        _linear_kernel,
        out_shape=jax.ShapeDtypeStruct((M, N), out_dtype),
        grid=grid,
        in_specs=[
            pl.BlockSpec((tm, tk), lambda i, j, kk: (i, kk)),
            pl.BlockSpec((tk, tn), lambda i, j, kk: (kk, j)),
            pl.BlockSpec((1, tn), lambda i, j, kk: (0, j)),
        ],
        out_specs=pl.BlockSpec((tm, tn), lambda i, j, kk: (i, j)),
        scratch_shapes=[pltpu.VMEM((tm, tn), jnp.float32)],
        compiler_params=pltpu.CompilerParams(
            dimension_semantics=("parallel", "parallel", "arbitrary"),
            vmem_limit_bytes=_vmem_limit_bytes(),
        ),
        cost_estimate=cost,
    )(x, w_t, b.reshape(1, N))


# ---------------------------------------------------------------------------
# Flash-style SDPA: grid (batch, q-tile, kv-tile), heads looped in-kernel,
# per-head online softmax state in VMEM scratch.
# ---------------------------------------------------------------------------
def _flash_body(q, k, v, masked, o_ref, m_sc, l_sc, acc_sc, *,
                num_heads, head_dim, scale, neg_min):
    kv_step = pl.program_id(2)

    @pl.when(kv_step == 0)
    def _():
        m_sc[...] = jnp.full(m_sc.shape, -jnp.inf, dtype=m_sc.dtype)
        l_sc[...] = jnp.zeros(l_sc.shape, dtype=l_sc.dtype)
        acc_sc[...] = jnp.zeros(acc_sc.shape, dtype=acc_sc.dtype)

    # One whole-tile scale of q (tq, d) instead of per-head / per-score scaling.
    q = q * jnp.asarray(scale, dtype=q.dtype)

    # TODO(synk): for head_dim < 128 the per-head lane slices are not
    # 128-aligned; a head-major projection layout would avoid the relayouts.
    for h in range(num_heads):
        lo = h * head_dim
        hi = lo + head_dim
        qh = q[:, lo:hi]
        kh = k[:, lo:hi]
        vh = v[:, lo:hi]
        # q @ k^T with the transpose folded into the MXU operand.
        s = jax.lax.dot_general(
            qh, kh,
            dimension_numbers=(((1,), (1,)), ((), ())),
            preferred_element_type=jnp.float32,
        )
        if masked is not None:
            s = jnp.where(masked, neg_min, s)  # masked_fill(mask == 0, finfo.min)

        m_prev = m_sc[h]                                   # (tq, 1)
        m_new = jnp.maximum(m_prev, jnp.max(s, axis=-1, keepdims=True))
        alpha = jnp.exp(m_prev - m_new)
        p = jnp.exp(s - m_new)                             # (tq, tkv) f32
        l_sc[h] = alpha * l_sc[h] + jnp.sum(p, axis=-1, keepdims=True)
        acc_sc[h] = alpha * acc_sc[h] + jnp.dot(
            p.astype(v.dtype), vh, preferred_element_type=jnp.float32)
        m_sc[h] = m_new

    @pl.when(kv_step == pl.num_programs(2) - 1)
    def _():
        for h in range(num_heads):
            lo = h * head_dim
            hi = lo + head_dim
            o_ref[0, :, lo:hi] = (
                acc_sc[h] * pl.reciprocal(l_sc[h], approx=True)   # EUP slot
            ).astype(o_ref.dtype)


def _flash_kernel(q_ref, k_ref, v_ref, o_ref, m_sc, l_sc, acc_sc, **kw):
    _flash_body(q_ref[0], k_ref[0], v_ref[0], None, o_ref, m_sc, l_sc, acc_sc, **kw)


def _flash_masked_kernel(q_ref, k_ref, v_ref, mask_ref, o_ref, m_sc, l_sc, acc_sc, **kw):
    masked = mask_ref[0] == 0          # hoisted: computed once, reused by all heads
    _flash_body(q_ref[0], k_ref[0], v_ref[0], masked, o_ref, m_sc, l_sc, acc_sc, **kw)


def sdpa(q, k, v, scale, num_heads, keep_mask=None, *, tq=256, tkv=512):
    """q:(bs, sq, d), k/v:(bs, sk, d) (bf16 preferred), keep_mask:(bs, sq, sk) int8."""
    bs, sq, d = q.shape
    sk = k.shape[1]
    hd = d // num_heads
    tq = _pick_tile(sq, tq, 32)     # 32 covers int8 mask sublane quantum too
    tkv = _pick_tile(sk, tkv, 128)  # mask last-dim lanes / bf16 K,V sublanes
    grid = (bs, sq // tq, sk // tkv)
    neg_min = float(jnp.finfo(jnp.float32).min)

    q_spec = pl.BlockSpec((1, tq, d), lambda b, i, j: (b, i, 0))
    kv_spec = pl.BlockSpec((1, tkv, d), lambda b, i, j: (b, j, 0))
    out_spec = pl.BlockSpec((1, tq, d), lambda b, i, j: (b, i, 0))
    scratch = [
        pltpu.VMEM((num_heads, tq, 1), jnp.float32),    # running max
        pltpu.VMEM((num_heads, tq, 1), jnp.float32),    # running sum
        pltpu.VMEM((num_heads, tq, hd), jnp.float32),   # output accumulator
    ]
    cparams = pltpu.CompilerParams(
        dimension_semantics=("parallel", "parallel", "arbitrary"),
        vmem_limit_bytes=_vmem_limit_bytes(),
    )
    n_q_blocks = sq // tq
    cost = pl.CostEstimate(
        flops=4 * bs * num_heads * sq * sk * hd,
        transcendentals=bs * num_heads * sq * sk,
        bytes_accessed=(q.size * q.dtype.itemsize
                        + 2 * k.size * k.dtype.itemsize * n_q_blocks
                        + bs * sq * d * q.dtype.itemsize
                        + (keep_mask.size if keep_mask is not None else 0)),
    )
    kw = dict(num_heads=num_heads, head_dim=hd, scale=scale, neg_min=neg_min)
    if keep_mask is None:
        return pl.pallas_call(
            partial(_flash_kernel, **kw),
            out_shape=jax.ShapeDtypeStruct((bs, sq, d), q.dtype),
            grid=grid,
            in_specs=[q_spec, kv_spec, kv_spec],
            out_specs=out_spec,
            scratch_shapes=scratch,
            compiler_params=cparams,
            cost_estimate=cost,
        )(q, k, v)
    mask_spec = pl.BlockSpec((1, tq, tkv), lambda b, i, j: (b, i, j))
    return pl.pallas_call(
        partial(_flash_masked_kernel, **kw),
        out_shape=jax.ShapeDtypeStruct((bs, sq, d), q.dtype),
        grid=grid,
        in_specs=[q_spec, kv_spec, kv_spec, mask_spec],
        out_specs=out_spec,
        scratch_shapes=scratch,
        compiler_params=cparams,
        cost_estimate=cost,
    )(q, k, v, keep_mask)


# ---------------------------------------------------------------------------
# Parameter preparation (done ONCE, outside the forward path)
# ---------------------------------------------------------------------------
def prepare_params(params):
    """Cast projection weights to bf16 and pre-fuse QKV / KV weight blocks."""
    wq = params["wq"].astype(jnp.bfloat16)
    wk = params["wk"].astype(jnp.bfloat16)
    wv = params["wv"].astype(jnp.bfloat16)
    wo = params["wo"].astype(jnp.bfloat16)
    out = dict(params)
    out.update(
        wq=wq, wk=wk, wv=wv, wo=wo,
        wqkv=jnp.concatenate([wq, wk, wv], axis=1),
        bqkv=jnp.concatenate([params["bq"], params["bk"], params["bv"]]),
        wkv=jnp.concatenate([wk, wv], axis=1),
        bkv=jnp.concatenate([params["bk"], params["bv"]]),
    )
    return out


# ---------------------------------------------------------------------------
# Multihead attention forward
# ---------------------------------------------------------------------------
def multihead_attention(q, k, v, params, num_heads, mask=None):
    bs, sq, d = q.shape
    sk = k.shape[1]
    assert d % num_heads == 0
    scale = 1.0 / math.sqrt(d)  # SDPA uses sqrt(d_model), not sqrt(head_dim)

    if "wqkv" not in params:
        params = prepare_params(params)

    if (q is k) and (k is v):
        # Self-attention: fused QKV projection — one pallas_call, x read once.
        qkv = linear(q.reshape(bs * sq, d), params["wqkv"], params["bqkv"],
                     out_dtype=jnp.bfloat16)
        qp = qkv[:, :d].reshape(bs, sq, d)
        kp = qkv[:, d:2 * d].reshape(bs, sk, d)
        vp = qkv[:, 2 * d:].reshape(bs, sk, d)
    elif k is v:
        # Cross-attention with shared memory: fuse K/V projection.
        qp = linear(q.reshape(bs * sq, d), params["wq"], params["bq"],
                    out_dtype=jnp.bfloat16).reshape(bs, sq, d)
        kv = linear(k.reshape(bs * sk, d), params["wkv"], params["bkv"],
                    out_dtype=jnp.bfloat16)
        kp = kv[:, :d].reshape(bs, sk, d)
        vp = kv[:, d:].reshape(bs, sk, d)
    else:
        qp = linear(q.reshape(bs * sq, d), params["wq"], params["bq"],
                    out_dtype=jnp.bfloat16).reshape(bs, sq, d)
        kp = linear(k.reshape(bs * sk, d), params["wk"], params["bk"],
                    out_dtype=jnp.bfloat16).reshape(bs, sk, d)
        vp = linear(v.reshape(bs * sk, d), params["wv"], params["bv"],
                    out_dtype=jnp.bfloat16).reshape(bs, sk, d)

    keep = None
    if mask is not None:
        keep = (mask != 0).astype(jnp.int8)   # narrow mask: 1=keep, 0=mask

    # SDPA reads/writes (bs, S, d) directly — no head-split transposes in HBM.
    x = sdpa(qp, kp, vp, scale, num_heads, keep)

    out = linear(x.reshape(bs * sq, d), params["wo"], params["bo"],
                 out_dtype=q.dtype).reshape(bs, sq, d)
    # TODO(synk): dropout is identity here (eval mode); stochastic training
    # dropout has no deterministic semantics to reproduce.
    return out


# ---------------------------------------------------------------------------
# Pure-JAX reference for correctness sanity check (f32 end to end)
# ---------------------------------------------------------------------------
def reference_mha(q, k, v, params, num_heads, mask=None):
    bs, sq, d = q.shape
    sk = k.shape[1]
    hd = d // num_heads
    qp = q.reshape(-1, d) @ params["wq"] + params["bq"]
    kp = k.reshape(-1, d) @ params["wk"] + params["bk"]
    vp = v.reshape(-1, d) @ params["wv"] + params["bv"]
    qh = qp.reshape(bs, sq, num_heads, hd).transpose(0, 2, 1, 3)
    kh = kp.reshape(bs, sk, num_heads, hd).transpose(0, 2, 1, 3)
    vh = vp.reshape(bs, sk, num_heads, hd).transpose(0, 2, 1, 3)
    s = jnp.einsum("bhqd,bhkd->bhqk", qh, kh) / math.sqrt(d)
    if mask is not None:
        s = jnp.where(mask[:, None, :, :] == 0, jnp.finfo(s.dtype).min, s)
    p = jax.nn.softmax(s, axis=-1)
    x = jnp.einsum("bhqk,bhkd->bhqd", p, vh)
    x = x.transpose(0, 2, 1, 3).reshape(bs * sq, d)
    return (x @ params["wo"] + params["bo"]).reshape(bs, sq, d)


if __name__ == "__main__":
    d_model, num_heads = 32, 4
    bs, seq = 2, 8

    key = jax.random.PRNGKey(0)
    ks = jax.random.split(key, 12)
    init = lambda k_, shape: 0.05 * jax.random.normal(k_, shape, jnp.float32)
    raw_params = {
        "wq": init(ks[0], (d_model, d_model)), "bq": init(ks[1], (d_model,)),
        "wk": init(ks[2], (d_model, d_model)), "bk": init(ks[3], (d_model,)),
        "wv": init(ks[4], (d_model, d_model)), "bv": init(ks[5], (d_model,)),
        "wo": init(ks[6], (d_model, d_model)), "bo": init(ks[7], (d_model,)),
    }
    params = prepare_params(raw_params)   # bf16 weights + fused QKV, done once

    # Case 1: self-attention (q is k is v) -> fused QKV path, no mask.
    x = jax.random.normal(ks[8], (bs, seq, d_model), jnp.float32)
    out1 = jax.block_until_ready(multihead_attention(x, x, x, params, num_heads))
    ref1 = reference_mha(x, x, x, raw_params, num_heads)
    assert out1.shape == (bs, seq, d_model)
    assert jnp.allclose(out1, ref1, atol=2e-2, rtol=2e-2), "self-attention mismatch"

    # Case 2: distinct q/k/v with a causal mask -> unfused path + masked kernel.
    q = jax.random.normal(ks[9], (bs, seq, d_model), jnp.float32)
    k = jax.random.normal(ks[10], (bs, seq, d_model), jnp.float32)
    v = jax.random.normal(ks[11], (bs, seq, d_model), jnp.float32)
    mask = jnp.broadcast_to(jnp.tril(jnp.ones((seq, seq), jnp.float32)), (bs, seq, seq))
    out2 = jax.block_until_ready(
        multihead_attention(q, k, v, params, num_heads, mask=mask))
    ref2 = reference_mha(q, k, v, raw_params, num_heads, mask=mask)
    assert jnp.allclose(out2, ref2, atol=2e-2, rtol=2e-2), "masked attention mismatch"

    print("KERNEL_OK")
</pallas_src>

<mosaic_0001>
module attributes {stable_mosaic.version = 11 : i64} {
  func.func @_linear_kernel(%arg0: i32, %arg1: i32, %arg2: i32, %arg3: memref<16x32xf32, #tpu.memory_space<vmem>>, %arg4: memref<32x96xbf16, #tpu.memory_space<vmem>>, %arg5: memref<1x96xf32, #tpu.memory_space<vmem>>, %arg6: memref<16x96xbf16, #tpu.memory_space<vmem>>, %arg7: memref<16x96xf32, #tpu.memory_space<vmem>>) attributes {dimension_semantics = [#tpu.dimension_semantics<parallel>, #tpu.dimension_semantics<parallel>, #tpu.dimension_semantics<arbitrary>], iteration_bounds = array<i64: 1, 1, 1>, scalar_prefetch = 0 : i64, scratch_operands = 1 : i64, tpu.core_type = #tpu.core_type<tc>, window_params = [{transform_indices = @transform_0, window_bounds = array<i64: 16, 32>}, {transform_indices = @transform_1, window_bounds = array<i64: 32, 96>}, {transform_indices = @transform_2, window_bounds = array<i64: 1, 96>}, {transform_indices = @transform_3, window_bounds = array<i64: 16, 96>}]} {
    %c0_i32 = arith.constant 0 : i32
    %0 = arith.cmpi eq, %arg2, %c0_i32 : i32
    %1 = arith.extui %0 : i1 to i32
    %c0_i32_0 = arith.constant 0 : i32
    %2 = arith.cmpi ne, %1, %c0_i32_0 : i32
    scf.if %2 {
      %cst_10 = arith.constant 0.000000e+00 : f32
      %13 = vector.broadcast %cst_10 : f32 to vector<16x96xf32>
      %c0_11 = arith.constant 0 : index
      %c0_12 = arith.constant 0 : index
      %14 = vector.load %arg7[%c0_11, %c0_12] : memref<16x96xf32, #tpu.memory_space<vmem>>, vector<16x96xf32>
      tpu.vector_store %arg7[%c0_11, %c0_12], %13 {strides = array<i32>} : memref<16x96xf32, #tpu.memory_space<vmem>>, vector<16x96xf32>,
    } else {
    }
    %c0 = arith.constant 0 : index
    %c0_1 = arith.constant 0 : index
    %3 = vector.load %arg7[%c0, %c0_1] : memref<16x96xf32, #tpu.memory_space<vmem>>, vector<16x96xf32>
    %c0_2 = arith.constant 0 : index
    %c0_3 = arith.constant 0 : index
    %4 = vector.load %arg3[%c0_2, %c0_3] : memref<16x32xf32, #tpu.memory_space<vmem>>, vector<16x32xf32>
    %5 = arith.truncf %4 : vector<16x32xf32> to vector<16x32xbf16>
    %c0_4 = arith.constant 0 : index
    %c0_5 = arith.constant 0 : index
    %6 = vector.load %arg4[%c0_4, %c0_5] : memref<32x96xbf16, #tpu.memory_space<vmem>>, vector<32x96xbf16>
    %cst = arith.constant dense<0.000000e+00> : vector<16x96xf32>
    %7 = tpu.matmul %5, %6, %cst {dimension_numbers = #tpu.dot_dimension_numbers<[1], [0], [0], [1], [0, 0, 1, 1], [], []>} : vector<16x32xbf16>, vector<32x96xbf16>, vector<16x96xf32> -> vector<16x96xf32>
    %8 = arith.addf %3, %7 : vector<16x96xf32>
    %c0_6 = arith.constant 0 : index
    %c0_7 = arith.constant 0 : index
    %9 = vector.load %arg7[%c0_6, %c0_7] : memref<16x96xf32, #tpu.memory_space<vmem>>, vector<16x96xf32>
    tpu.vector_store %arg7[%c0_6, %c0_7], %8 {strides = array<i32>} : memref<16x96xf32, #tpu.memory_space<vmem>>, vector<16x96xf32>,
    %c0_i32_8 = arith.constant 0 : i32
    %10 = arith.cmpi eq, %arg2, %c0_i32_8 : i32
    %11 = arith.extui %10 : i1 to i32
    %c0_i32_9 = arith.constant 0 : i32
    %12 = arith.cmpi ne, %11, %c0_i32_9 : i32
    scf.if %12 {
      %c0_10 = arith.constant 0 : index
      %c0_11 = arith.constant 0 : index
      %13 = vector.load %arg7[%c0_10, %c0_11] : memref<16x96xf32, #tpu.memory_space<vmem>>, vector<16x96xf32>
      %c0_12 = arith.constant 0 : index
      %c0_13 = arith.constant 0 : index
      %14 = vector.load %arg5[%c0_12, %c0_13] : memref<1x96xf32, #tpu.memory_space<vmem>>, vector<1x96xf32>
      %15 = vector.broadcast %14 : vector<1x96xf32> to vector<16x96xf32>
      %16 = arith.addf %13, %15 : vector<16x96xf32>
      %17 = arith.truncf %16 : vector<16x96xf32> to vector<16x96xbf16>
      %c0_14 = arith.constant 0 : index
      %c0_15 = arith.constant 0 : index
      %18 = vector.load %arg6[%c0_14, %c0_15] : memref<16x96xbf16, #tpu.memory_space<vmem>>, vector<16x96xbf16>
      tpu.vector_store %arg6[%c0_14, %c0_15], %17 {strides = array<i32>} : memref<16x96xbf16, #tpu.memory_space<vmem>>, vector<16x96xbf16>,
    } else {
    }
    return
  }
  func.func @transform_0(%arg0: i32, %arg1: i32, %arg2: i32) -> (i32, i32) {
    %c0_i32 = arith.constant 0 : i32
    return %arg0, %arg2 : i32, i32
  }
  func.func @transform_1(%arg0: i32, %arg1: i32, %arg2: i32) -> (i32, i32) {
    %c0_i32 = arith.constant 0 : i32
    return %arg2, %arg1 : i32, i32
  }
  func.func @transform_2(%arg0: i32, %arg1: i32, %arg2: i32) -> (i32, i32) {
    %c0_i32 = arith.constant 0 : i32
    %c0_i32_0 = arith.constant 0 : i32
    return %c0_i32, %arg1 : i32, i32
  }
  func.func @transform_3(%arg0: i32, %arg1: i32, %arg2: i32) -> (i32, i32) {
    %c0_i32 = arith.constant 0 : i32
    return %arg0, %arg1 : i32, i32
  }
}

</mosaic_0001>

<bundles_post_ra>
// kernel: tpu_custom_call.1
= control target key start
LH: loop header
LB: loop body
LE: loop exit
PB: predicated region body
PF: predicated region fallthrough
CT: control target
= control target key end

     0   :  { %8 = vsyncpa [#allocation4], 0  ;;  %s345_s0 = inlined_call_operand.hbm [shape: f32[16,32], index: 0, kind: input, shape index: {}]   ;;  %s346_s1 = inlined_call_operand.hbm [shape: bf16[32,96], index: 1, kind: input, shape index: {}]   ;;  %s347_s2 = inlined_call_operand.vmem [shape: f32[1,96], index: 2, kind: input, shape index: {}]   ;;  %s348_s3 = inlined_call_operand.hbm [shape: bf16[16,96], index: 3, kind: output, shape index: {}]  }
   0x1   :  { %9 = vsyncpa [#allocation7], 0 }
   0x2   :  { %10 = vsyncpa [#allocation5], 0  ;;  %s267_s12 = smov [#allocation3]   ;;  %s195_s16 = scalar_lea.hbm %s345_s0, 256 }
   0x3   :  { %s16_s13 = sshll.u32 %s267_s12, 4  ;;  %p196_p0 = scmp.ne.s32.totalorder %s345_s0, %s195_s16  ;;  %s17_s13 = int_to_ptr.vmem [resolvable:$true] %s16_s13 }
   0x4   :  { %p199_p1 = scmp.lt.u32.totalorder %s195_s16, %s345_s0 }
   0x6   :  { %p201_p2 = pnand %p199_p1, %p196_p0 }
   0x8   :  { %204 = shalt.err (!%p201_p2)
}
   0x9   :  { %s205_s21 = scalar_lea.vmem %s17_s13, 256  ;;  %p210_p4 = scmp.lt.s32.totalorder %s17_s13, %s17_s13 }
   0xa   :  { %p206_p3 = scmp.ne.s32.totalorder %s17_s13, %s205_s21  ;;  %p211_p5 = scmp.lt.s32.totalorder %s205_s21, %s205_s21 }
   0xc   :  { %p212_p6 = por %p211_p5, %p210_p4 }
   0xe   :  { %p213_p7 = pnand %p212_p6, %p206_p3 }
  0x10   :  { %216 = shalt.err (!%p213_p7)
}
  0x11   :  { %s268_s22 = smov 128   ;;  %s269_s23 = smov 8  }
  0x12   :  { %22 = dma.hbm_to_vmem [thread:$0]  %s345_s0, 256, %s17_s13, [#allocation4], %s268_s22, %s268_s22, %s269_s23  }
  0x13   :  { %s270_s26 = smov [#allocation6]   ;;  %s217_s30 = scalar_lea.hbm %s346_s1, 256 }
  0x14   :  { %s28_s27 = sshll.u32 %s270_s26, 4  ;;  %p218_p8 = scmp.ne.s32.totalorder %s346_s1, %s217_s30  ;;  %s29_s27 = int_to_ptr.vmem [resolvable:$true] %s28_s27 }
  0x15   :  { %p221_p9 = scmp.lt.u32.totalorder %s217_s30, %s346_s1 }
  0x17   :  { %p223_p10 = pnand %p221_p9, %p218_p8 }
  0x19   :  { %226 = shalt.err (!%p223_p10)
}
  0x1a   :  { %s227_s8 = scalar_lea.vmem %s29_s27, 256  ;;  %p232_p12 = scmp.lt.s32.totalorder %s29_s27, %s29_s27 }
  0x1b   :  { %p228_p11 = scmp.ne.s32.totalorder %s29_s27, %s227_s8  ;;  %p233_p13 = scmp.lt.s32.totalorder %s227_s8, %s227_s8 }
  0x1d   :  { %p234_p0 = por %p233_p13, %p232_p12 }
  0x1f   :  { %p235_p1 = pnand %p234_p0, %p228_p11 }
  0x21   :  { %238 = shalt.err (!%p235_p1)
}
  0x22   :  { %s271_s0 = smov 64   ;;  %s272_s9 = smov 4  }
  0x23   :  { %34 = dma.hbm_to_vmem [thread:$0]  %s346_s1, 256, %s29_s27, [#allocation7], %s271_s0, %s271_s0, %s272_s9  }
  0x24   :  { %261 = dma.done.wait [#allocation4], 256  }
  0x25   :  { %262 = vsyncadd [#allocation4], 4294967040 }
  0x26   :  { %263 = dma.done.wait [#allocation7], 256  }
  0x27   :  { %264 = vsyncadd [#allocation7], 4294967040  ;;  %vm48_vm0 = vcmask 785408   ;;  %v273_v0 = vmov 0.0   ;;  %vm274_vm1 = vmmov 0   ;;  %v193_v1 = vld [vmem:[#allocation6] sm:$0xff]  }
  0x28   :  { %49 = vst.msk [vmem:[#allocation2] sm:$0xff] %vm48_vm0, %v273_v0  ;;  %50 = vst.msk [vmem:[#allocation2 + $0x8] sm:$0xff] %vm48_vm0, %v273_v0  ;;  %176 = vmatprep.subr.bf16.mxu0 %v273_v0  ;;  %180 = vmatprep.mubr.msk.bf16.mxu0 %vm274_vm1, %v273_v0  ;;  %v194_v2 = vld [vmem:[#allocation6 + $0x8] sm:$0xff]   ;;  %v53_v3 = vld [vmem:[#allocation3] sm:$0xff]  ;;  %vm72_vm2 = vcmask 261120   ;;  %vm144_vm3 = vcmask 781312  }
  0x29   :  { %177 = vmatpush3.bf16.msra.mxu0 %v193_v1  ;;  %v54_v4 = vld [vmem:[#allocation3 + $0x8] sm:$0xff]  ;;  %v168_v14 = vld [vmem:[%s347_s2] ss:$0 sm:$0xff]  ;;  %s275_s13 = smov [#allocation8]  }
  0x2a   :  { %178 = vmatprep.subr.bf16.mxu0 %v273_v0  ;;  %v55_v5 = vpack.c.bf16 %v54_v4, %v53_v3  ;;  %s152_s14 = sshll.u32 %s275_s13, 4  ;;  %s153_s14 = int_to_ptr.vmem [resolvable:$true] %s152_s14 }
  0x2b   :  { %s239_s15 = scalar_lea.vmem %s153_s14, 128  ;;  %p244_p3 = scmp.lt.s32.totalorder %s153_s14, %s153_s14 }
  0x2c   :  { %p240_p2 = scmp.ne.s32.totalorder %s153_s14, %s239_s15  ;;  %p245_p4 = scmp.lt.s32.totalorder %s239_s15, %s239_s15 }
  0x2d   :  { %179 = vmatpush3.bf16.msra.mxu0 %v194_v2 }
  0x2e   :  { %p246_p5 = por %p245_p4, %p244_p3 }
  0x2f   :  { %v51_v6 = vld [vmem:[#allocation2] sm:$0xff]  ;;  %v52_v8 = vld [vmem:[#allocation2 + $0x8] sm:$0xff] }
  0x30   :  { %181 = vmatmul.mubr.msk.bf16.vlgmr.msra.gmra.mrb[0].mxu0 %vm72_vm2, %v55_v5  ;;  %p247_p6 = pnand %p246_p5, %p240_p2 }
 0x103   :  { %v110_v7 = vpop.f32.mrb[0].mxu0 }
 0x104   :  { %v117_v9 = vadd.f32 %v110_v7, %v51_v6  ;;  %v182_v10 = vpop.f32.mrb[1].mxu0 }
 0x105   :  { %v113_v11 = vpop.f32.mrb[2].mxu0 }
 0x106   :  { %120 = vst.msk [vmem:[#allocation2] sm:$0xff] %vm48_vm0, %v117_v9  ;;  %v118_v12 = vadd.f32 %v113_v11, %v52_v8  ;;  %v183_v13 = vpop.f32.mrb[3].mxu0 }
 0x108   :  { %121 = vst.msk [vmem:[#allocation2 + $0x8] sm:$0xff] %vm48_vm0, %v118_v12 }
 0x10d   :  { %v125_v15 = vld [vmem:[#allocation2] sm:$0xff] }
 0x10e   :  { %v134_v16 = vadd.f32 %v168_v14, %v125_v15 }
 0x10f   :  { %v126_v17 = vld [vmem:[#allocation2 + $0x8] sm:$0xff] }
 0x110   :  { %v135_v18 = vadd.f32 %v168_v14, %v126_v17  ;;  %v171_v19 = vpack.c.bf16 %v134_v16, %v134_v16 }
 0x112   :  { %v172_v20 = vpack.c.bf16 %v135_v18, %v135_v18  ;;  %145 = vst.msk [vmem:[#allocation8] sm:$0xf] %vm144_vm3, %v171_v19 }
 0x114   :  { %146 = vst.msk [vmem:[#allocation8 + $0x4] sm:$0xf] %vm144_vm3, %v172_v20 }
 0x115   :  { %250 = shalt.err (!%p247_p6)
}
 0x116   :  { %s251_s17 = scalar_lea.hbm %s348_s3, 128 }
 0x117   :  { %p252_p7 = scmp.ne.s32.totalorder %s348_s3, %s251_s17  ;;  %p255_p8 = scmp.lt.u32.totalorder %s251_s17, %s348_s3 }
 0x119   :  { %p257_p9 = pnand %p255_p8, %p252_p7 }
 0x11b   :  { %260 = shalt.err (!%p257_p9)
}
 0x11c   :  { %158 = dma.vmem_to_hbm [thread:$0]  %s153_s14, 128, %s348_s3, [#allocation5], %s271_s0, %s271_s0, %s272_s9  }
 0x11d   :  { %265 = dma.done.wait [#allocation5], 128  }
 0x11e   :  { %266 = vsyncadd [#allocation5], 4294967168 }
 0x11f   :  { %162 = vsyncpa [#allocation4], 1 }
 0x120   :  { %163 = vsyncpa [#allocation7], 1 }
 0x121   :  { %164 = vsyncpa [#allocation5], 1 }

</bundles_post_ra>
